<compile_context>
chip_gen: v6e
topology: v6e:2x2x1
jax: 0.10.0
libtpu: 0.0.40
codegen_flags: <defaults>
</compile_context>

<pallas_src>
import functools

import jax
import jax.numpy as jnp
from jax.experimental import pallas as pl
from jax.experimental.pallas import tpu as pltpu


def channel_attention_kernel(x_ref, w1t_ref, w2t_ref, o_ref, sum_ref, max_ref,
                             *, l_total, tl):
    # x_ref:   (TB, C, TL)  current L tile of a batch block (L on lanes)
    # w1t_ref: (C, H)       Linear1 weight pre-transposed (VMEM-resident)
    # w2t_ref: (H, C)       Linear2 weight pre-transposed (VMEM-resident)
    # o_ref:   (TB, 1, C)   per-batch-block output (written once, last L step)
    # sum_ref: (TB, C) f32  running sum accumulator
    # max_ref: (TB, C)      running max accumulator (input dtype; max is exact)
    li = pl.program_id(1)

    @pl.when(li == 0)
    def _init():
        sum_ref[...] = jnp.zeros_like(sum_ref)
        max_ref[...] = jnp.full_like(max_ref, -jnp.inf)

    x = x_ref[...]  # keep input dtype; only the sum accumulation is widened

    if l_total % tl != 0:
        # Mask the padded tail of the last L tile: 0 for sum, -inf for max.
        lane = jax.lax.broadcasted_iota(jnp.int32, x.shape, dimension=2)
        valid = (li * tl + lane) < l_total
        x_sum = jnp.where(valid, x, jnp.zeros_like(x))
        x_max = jnp.where(valid, x, jnp.full_like(x, -jnp.inf))
    else:
        x_sum = x
        x_max = x

    # Streamed pooling: f32 sum, native-dtype max.
    sum_ref[...] += jnp.sum(x_sum, axis=-1, dtype=jnp.float32)         # (TB, C)
    max_ref[...] = jnp.maximum(max_ref[...], jnp.max(x_max, axis=-1))  # (TB, C)

    @pl.when(li == pl.num_programs(1) - 1)
    def _finalize():
        tb = sum_ref.shape[0]
        avg = sum_ref[...] * jnp.float32(1.0 / l_total)   # single scale at the end
        mx = max_ref[...].astype(jnp.float32)
        pooled = jnp.concatenate([avg, mx], axis=0)       # (2*TB, C): fused avg/max FC
        w1t = w1t_ref[...].astype(jnp.float32)            # (C, H)
        w2t = w2t_ref[...].astype(jnp.float32)            # (H, C)
        h = jnp.dot(pooled, w1t, preferred_element_type=jnp.float32)   # (2*TB, H)
        h = jnp.maximum(h, 0.0)                                        # ReLU
        y = jnp.dot(h, w2t, preferred_element_type=jnp.float32)        # (2*TB, C)
        out = y[:tb, :] + y[tb:, :]                                    # (TB, C)
        o_ref[...] = jax.nn.sigmoid(out)[:, None, :].astype(o_ref.dtype)


def channel_attention(x, w1, w2, *, tl=512):
    """x: (B, C, L); w1: (H, C) = Linear(C->H).weight; w2: (C, H) = Linear(H->C).weight."""
    b, c, l = x.shape
    hdim = w1.shape[0]
    itemsize = jnp.dtype(x.dtype).itemsize

    # Pre-transpose weights in plain JAX (glue) -> row-major MXU matmuls in kernel.
    w1t = jnp.transpose(w1)  # (C, H)
    w2t = jnp.transpose(w2)  # (H, C)

    # Batch tile: largest divisor of B up to 8 (fewer grid steps, batched finalize
    # matmul, every block exactly full).
    tb = 1
    for cand in range(min(b, 8), 0, -1):
        if b % cand == 0:
            tb = cand
            break
    nb = b // tb

    # Lane-dense L tile: multiple of 128, sized so the double-buffered x tile
    # stays under ~16 MiB (safe for v7x's 64 MiB physical VMEM per TC).
    budget = 16 * 1024 * 1024
    max_tl = max(128, (budget // (2 * tb * c * itemsize)) // 128 * 128)
    tl = max(128, (tl // 128) * 128)
    tl = min(tl, max_tl)
    if l <= tl:
        tl = l  # single L block: block dim == full dim, no masking needed
    num_l = pl.cdiv(l, tl)

    kernel = functools.partial(channel_attention_kernel, l_total=l, tl=tl)

    grid_spec = pltpu.PrefetchScalarGridSpec(
        num_scalar_prefetch=0,
        grid=(nb, num_l),  # batch parallel, L reduction last ("arbitrary")
        in_specs=[
            pl.BlockSpec((tb, c, tl), lambda bi, li: (bi, 0, li)),
            pl.BlockSpec((c, hdim), lambda bi, li: (0, 0)),   # weights resident
            pl.BlockSpec((hdim, c), lambda bi, li: (0, 0)),   # weights resident
        ],
        out_specs=pl.BlockSpec((tb, 1, c), lambda bi, li: (bi, 0, 0)),
        scratch_shapes=[
            pltpu.VMEM((tb, c), jnp.float32),  # running sum
            pltpu.VMEM((tb, c), x.dtype),      # running max
        ],
    )

    w_bytes = 2 * c * hdim * jnp.dtype(w1.dtype).itemsize
    cost = pl.CostEstimate(
        flops=2 * b * c * l + 4 * (2 * b) * c * hdim,
        transcendentals=b * c,
        bytes_accessed=b * c * l * itemsize + w_bytes + b * c * itemsize,
    )

    tile_bytes = 2 * tb * c * tl * itemsize  # double-buffered x tile
    vmem_limit = int(min(64 * 1024 * 1024,
                         max(32 * 1024 * 1024,
                             2 * (tile_bytes + w_bytes) + (2 << 20))))

    out = pl.pallas_call(
        kernel,
        out_shape=jax.ShapeDtypeStruct((b, 1, c), x.dtype),
        grid_spec=grid_spec,
        compiler_params=pltpu.CompilerParams(
            dimension_semantics=("parallel", "arbitrary"),
            vmem_limit_bytes=vmem_limit,
        ),
        cost_estimate=cost,
    )(x, w1t, w2t)

    return out.reshape(b, c, 1)


def _reference(x, w1, w2):
    # Pure-JAX reference mirroring the PyTorch forward.
    avg = jnp.mean(x, axis=-1)
    mx = jnp.max(x, axis=-1)

    def fc(v):
        h = jnp.maximum(v @ w1.T, 0.0)
        return h @ w2.T

    out = fc(avg) + fc(mx)
    return jax.nn.sigmoid(out)[..., None]


if __name__ == "__main__":
    # batch=2, channels=64, length=320, reduction_ratio=16 -> hidden=4.
    # With tl=128 this exercises the streamed reduction: 3 L tiles, masked tail of 64.
    B, C, L = 2, 64, 320
    R = 16
    H = C // R

    key = jax.random.PRNGKey(0)
    kx, k1, k2 = jax.random.split(key, 3)

    x = jax.random.normal(kx, (B, C, L), dtype=jnp.float32)
    w1 = jax.random.normal(k1, (H, C), dtype=jnp.float32) * 0.1  # Linear(C -> H).weight
    w2 = jax.random.normal(k2, (C, H), dtype=jnp.float32) * 0.1  # Linear(H -> C).weight

    out = channel_attention(x, w1, w2, tl=128)
    out = jax.block_until_ready(out)

    ref = _reference(x, w1, w2)
    assert out.shape == (B, C, 1), out.shape
    assert jnp.allclose(out, ref, atol=1e-5, rtol=1e-5), float(jnp.max(jnp.abs(out - ref)))

    print("KERNEL_OK")
</pallas_src>

<mosaic_0001>
module attributes {stable_mosaic.version = 11 : i64} {
  func.func @channel_attention_kernel(%arg0: i32, %arg1: i32, %arg2: memref<2x64x128xf32, #tpu.memory_space<vmem>>, %arg3: memref<64x4xf32, #tpu.memory_space<vmem>>, %arg4: memref<4x64xf32, #tpu.memory_space<vmem>>, %arg5: memref<2x1x64xf32, #tpu.memory_space<vmem>>, %arg6: memref<2x64xf32, #tpu.memory_space<vmem>>, %arg7: memref<2x64xf32, #tpu.memory_space<vmem>>) attributes {dimension_semantics = [#tpu.dimension_semantics<parallel>, #tpu.dimension_semantics<arbitrary>], iteration_bounds = array<i64: 1, 3>, scalar_prefetch = 0 : i64, scratch_operands = 2 : i64, tpu.core_type = #tpu.core_type<tc>, window_params = [{transform_indices = @transform_0, window_bounds = array<i64: 2, 64, 128>}, {pipeline_mode = #tpu.pipeline_mode<synchronous>, transform_indices = @transform_1, window_bounds = array<i64: 64, 4>}, {pipeline_mode = #tpu.pipeline_mode<synchronous>, transform_indices = @transform_2, window_bounds = array<i64: 4, 64>}, {transform_indices = @transform_3, window_bounds = array<i64: 2, 1, 64>}]} {
    %c0_i32 = arith.constant 0 : i32
    %0 = arith.cmpi eq, %arg1, %c0_i32 : i32
    %1 = arith.extui %0 : i1 to i32
    %c0_i32_0 = arith.constant 0 : i32
    %2 = arith.cmpi ne, %1, %c0_i32_0 : i32
    scf.if %2 {
      %cst_15 = arith.constant 0.000000e+00 : f32
      %25 = vector.broadcast %cst_15 : f32 to vector<2x64xf32>
      %c0_16 = arith.constant 0 : index
      %c0_17 = arith.constant 0 : index
      %26 = vector.load %arg6[%c0_16, %c0_17] : memref<2x64xf32, #tpu.memory_space<vmem>>, vector<2x64xf32>
      tpu.vector_store %arg6[%c0_16, %c0_17], %25 {strides = array<i32>} : memref<2x64xf32, #tpu.memory_space<vmem>>, vector<2x64xf32>,
      %cst_18 = arith.constant 0xFF800000 : f32
      %27 = vector.broadcast %cst_18 : f32 to vector<2x64xf32>
      %c0_19 = arith.constant 0 : index
      %c0_20 = arith.constant 0 : index
      %28 = vector.load %arg7[%c0_19, %c0_20] : memref<2x64xf32, #tpu.memory_space<vmem>>, vector<2x64xf32>
      tpu.vector_store %arg7[%c0_19, %c0_20], %27 {strides = array<i32>} : memref<2x64xf32, #tpu.memory_space<vmem>>, vector<2x64xf32>,
    } else {
    }
    %c0 = arith.constant 0 : index
    %c0_1 = arith.constant 0 : index
    %c0_2 = arith.constant 0 : index
    %3 = vector.load %arg2[%c0, %c0_1, %c0_2] : memref<2x64x128xf32, #tpu.memory_space<vmem>>, vector<2x64x128xf32>
    %4 = tpu.iota {dimensions = array<i32: 2>} : vector<2x64x128xi32>
    %c128_i32 = arith.constant 128 : i32
    %5 = arith.muli %arg1, %c128_i32 : i32
    %6 = vector.broadcast %5 : i32 to vector<2x64x128xi32>
    %7 = arith.addi %6, %4 : vector<2x64x128xi32>
    %c320_i32 = arith.constant 320 : i32
    %8 = vector.broadcast %c320_i32 : i32 to vector<2x64x128xi32>
    %9 = arith.cmpi slt, %7, %8 : vector<2x64x128xi32>
    %cst = arith.constant 0.000000e+00 : f32
    %10 = vector.broadcast %cst : f32 to vector<2x64x128xf32>
    %11 = arith.select %9, %3, %10 : vector<2x64x128xi1>, vector<2x64x128xf32>
    %cst_3 = arith.constant 0xFF800000 : f32
    %12 = vector.broadcast %cst_3 : f32 to vector<2x64x128xf32>
    %13 = arith.select %9, %3, %12 : vector<2x64x128xi1>, vector<2x64x128xf32>
    %c0_4 = arith.constant 0 : index
    %c0_5 = arith.constant 0 : index
    %14 = vector.load %arg6[%c0_4, %c0_5] : memref<2x64xf32, #tpu.memory_space<vmem>>, vector<2x64xf32>
    %cst_6 = arith.constant dense<0.000000e+00> : vector<2x64xf32>
    %15 = vector.multi_reduction <add>, %11, %cst_6 [2] : vector<2x64x128xf32> to vector<2x64xf32>
    %16 = arith.addf %14, %15 : vector<2x64xf32>
    %c0_7 = arith.constant 0 : index
    %c0_8 = arith.constant 0 : index
    %17 = vector.load %arg6[%c0_7, %c0_8] : memref<2x64xf32, #tpu.memory_space<vmem>>, vector<2x64xf32>
    tpu.vector_store %arg6[%c0_7, %c0_8], %16 {strides = array<i32>} : memref<2x64xf32, #tpu.memory_space<vmem>>, vector<2x64xf32>,
    %c0_9 = arith.constant 0 : index
    %c0_10 = arith.constant 0 : index
    %18 = vector.load %arg7[%c0_9, %c0_10] : memref<2x64xf32, #tpu.memory_space<vmem>>, vector<2x64xf32>
    %cst_11 = arith.constant dense<0xFF800000> : vector<2x64xf32>
    %19 = vector.multi_reduction <maximumf>, %13, %cst_11 [2] : vector<2x64x128xf32> to vector<2x64xf32>
    %20 = arith.maximumf %18, %19 : vector<2x64xf32>
    %c0_12 = arith.constant 0 : index
    %c0_13 = arith.constant 0 : index
    %21 = vector.load %arg7[%c0_12, %c0_13] : memref<2x64xf32, #tpu.memory_space<vmem>>, vector<2x64xf32>
    tpu.vector_store %arg7[%c0_12, %c0_13], %20 {strides = array<i32>} : memref<2x64xf32, #tpu.memory_space<vmem>>, vector<2x64xf32>,
    %c2_i32 = arith.constant 2 : i32
    %22 = arith.cmpi eq, %arg1, %c2_i32 : i32
    %23 = arith.extui %22 : i1 to i32
    %c0_i32_14 = arith.constant 0 : i32
    %24 = arith.cmpi ne, %23, %c0_i32_14 : i32
    scf.if %24 {
      %c0_15 = arith.constant 0 : index
      %c0_16 = arith.constant 0 : index
      %25 = vector.load %arg6[%c0_15, %c0_16] : memref<2x64xf32, #tpu.memory_space<vmem>>, vector<2x64xf32>
      %cst_17 = arith.constant 3.125000e-03 : f32
      %26 = vector.broadcast %cst_17 : f32 to vector<2x64xf32>
      %27 = arith.mulf %25, %26 : vector<2x64xf32>
      %c0_18 = arith.constant 0 : index
      %c0_19 = arith.constant 0 : index
      %28 = vector.load %arg7[%c0_18, %c0_19] : memref<2x64xf32, #tpu.memory_space<vmem>>, vector<2x64xf32>
      %29 = tpu.concatenate %27, %28 in 0 : vector<2x64xf32>, vector<2x64xf32> -> vector<4x64xf32>
      %c0_20 = arith.constant 0 : index
      %c0_21 = arith.constant 0 : index
      %30 = vector.load %arg3[%c0_20, %c0_21] : memref<64x4xf32, #tpu.memory_space<vmem>>, vector<64x4xf32>
      %c0_22 = arith.constant 0 : index
      %c0_23 = arith.constant 0 : index
      %31 = vector.load %arg4[%c0_22, %c0_23] : memref<4x64xf32, #tpu.memory_space<vmem>>, vector<4x64xf32>
      %cst_24 = arith.constant dense<0.000000e+00> : vector<4x4xf32>
      %32 = tpu.matmul %29, %30, %cst_24 {dimension_numbers = #tpu.dot_dimension_numbers<[1], [0], [0], [1], [0, 0, 1, 1], [], []>} : vector<4x64xf32>, vector<64x4xf32>, vector<4x4xf32> -> vector<4x4xf32>
      %cst_25 = arith.constant 0.000000e+00 : f32
      %33 = vector.broadcast %cst_25 : f32 to vector<4x4xf32>
      %34 = arith.maximumf %32, %33 : vector<4x4xf32>
      %cst_26 = arith.constant dense<0.000000e+00> : vector<4x64xf32>
      %35 = tpu.matmul %34, %31, %cst_26 {dimension_numbers = #tpu.dot_dimension_numbers<[1], [0], [0], [1], [0, 0, 1, 1], [], []>} : vector<4x4xf32>, vector<4x64xf32>, vector<4x64xf32> -> vector<4x64xf32>
      %36 = vector.extract_strided_slice %35 {offsets = [0, 0], sizes = [2, 64], strides = [1, 1]} : vector<4x64xf32> to vector<2x64xf32>
      %37 = vector.extract_strided_slice %35 {offsets = [2, 0], sizes = [2, 64], strides = [1, 1]} : vector<4x64xf32> to vector<2x64xf32>
      %38 = arith.addf %36, %37 : vector<2x64xf32>
      %39 = arith.negf %38 : vector<2x64xf32>
      %40 = math.exp %39 : vector<2x64xf32>
      %cst_27 = arith.constant 1.000000e+00 : f32
      %41 = vector.broadcast %cst_27 : f32 to vector<2x64xf32>
      %42 = arith.addf %41, %40 : vector<2x64xf32>
      %43 = arith.divf %41, %42 : vector<2x64xf32>
      %44 = vector.shape_cast %43 : vector<2x64xf32> to vector<2x1x64xf32>
      %c0_28 = arith.constant 0 : index
      %c0_29 = arith.constant 0 : index
      %c0_30 = arith.constant 0 : index
      %45 = vector.load %arg5[%c0_28, %c0_29, %c0_30] : memref<2x1x64xf32, #tpu.memory_space<vmem>>, vector<2x1x64xf32>
      tpu.vector_store %arg5[%c0_28, %c0_29, %c0_30], %44 {strides = array<i32>} : memref<2x1x64xf32, #tpu.memory_space<vmem>>, vector<2x1x64xf32>,
    } else {
    }
    return
  }
  func.func @transform_0(%arg0: i32, %arg1: i32) -> (i32, i32, i32) {
    %c0_i32 = arith.constant 0 : i32
    %c0_i32_0 = arith.constant 0 : i32
    return %arg0, %c0_i32, %arg1 : i32, i32, i32
  }
  func.func @transform_1(%arg0: i32, %arg1: i32) -> (i32, i32) {
    %c0_i32 = arith.constant 0 : i32
    %c0_i32_0 = arith.constant 0 : i32
    %c0_i32_1 = arith.constant 0 : i32
    return %c0_i32, %c0_i32_0 : i32, i32
  }
  func.func @transform_2(%arg0: i32, %arg1: i32) -> (i32, i32) {
    %c0_i32 = arith.constant 0 : i32
    %c0_i32_0 = arith.constant 0 : i32
    %c0_i32_1 = arith.constant 0 : i32
    return %c0_i32, %c0_i32_0 : i32, i32
  }
  func.func @transform_3(%arg0: i32, %arg1: i32) -> (i32, i32, i32) {
    %c0_i32 = arith.constant 0 : i32
    %c0_i32_0 = arith.constant 0 : i32
    %c0_i32_1 = arith.constant 0 : i32
    return %arg0, %c0_i32, %c0_i32_0 : i32, i32, i32
  }
}

</mosaic_0001>

<bundles_post_ra>
// kernel: tpu_custom_call.1
= control target key start
LH: loop header
LB: loop body
LE: loop exit
PB: predicated region body
PF: predicated region fallthrough
CT: control target
= control target key end

     0   :  { %8 = vsyncpa [#allocation5], 0  ;;  %s1477_s0 = inlined_call_operand.hbm [shape: f32[2,64,320], index: 0, kind: input, shape index: {}]   ;;  %s1478_s1 = inlined_call_operand.vmem [shape: f32[64,4], index: 1, kind: input, shape index: {}]   ;;  %s1479_s2 = inlined_call_operand.vmem [shape: f32[4,64], index: 2, kind: input, shape index: {}]   ;;  %s1480_s3 = inlined_call_operand.hbm [shape: f32[2,1,64], index: 3, kind: output, shape index: {}]  }
   0x1   :  { %10 = vsyncpa [#allocation5 + $0x1], 0 }
   0x2   :  { %11 = vsyncpa [#allocation6], 0  ;;  %s1095_s12 = smov 0   ;;  %s1097_s13 = smov 0  }
   0x3   :  { %s1099_s14 = smov 0   ;;  %s1101_s15 = smov 0  }
   0x4   :  { %s1103_s16 = smov 0   ;;  %s1105_s17 = smov 0  }
   0x5 LB: > { %s826_s18 = sadd.s32 4294967295, %s1061_s17   ;;  %s26_s19 = sadd.s32 1, %s1057_s16  ;;  %s1061_s17 = sphi %s1105_s17, %s17_s17   ;;  %s1057_s16 = sphi %s1103_s16, %s1489_s16   ;;  %s1053_s15 = sphi %s1101_s15, %s1488_s15   ;;  %s1049_s14 = sphi %s1099_s14, %s1487_s14   ;;  %s1045_s13 = sphi %s1097_s13, %s1486_s13   ;;  %s1041_s12 = sphi %s1095_s12, %s1485_s12  }
   0x6   : > { %p27_p0 = scmp.ge.s32.totalorder %s26_s19, 3  ;;  %s38_s20 = sadd.s32 1, %s1049_s14 }
   0x7   : > { %p45_p1 = scmp.ne.s32.totalorder %s1049_s14, %s1045_s13  ;;  %p46_p2 = scmp.eq.s32.totalorder %s1061_s17, 0 }
   0x8   : > { %s1491_s19 = smov (%p27_p0, %s26_s19), 0  ;;  %p51_p4 = scmp.ne.s32.totalorder %s1045_s13, %s1041_s12 }
   0x9   : > { %p1131_p3 = por %p46_p2, %p45_p1  ;;  %s34_s22 = ssub.s32 %s1057_s16, %s1491_s19 }
   0xa   : > { %p52_p5 = scmp.eq.s32.totalorder %s826_s18, 0  ;;  %p36_p6 = scmp.eq.s32.totalorder %s34_s22, 0 }
   0xb   : > { %p889_p8 = scmp.lt.s32.totalorder %s1061_s17, 3  ;;  %s149_s25 = sand.u32 1, %s1049_s14  }
   0xc   : > { %p1140_p7 = por %p52_p5, %p51_p4  ;;  %s830_s26 = sshll.u32 %s1057_s16, 7 }
   0xd   : > { %s1146_s24 = scalar_select %p36_p6, %s1049_s14, %s38_s20  }
   0xe   : > { %s829_s27 = sshll.u32 %s149_s25, 7  ;;  %s161_s30 = scalar_lea.hbm %s1477_s0, %s830_s26 }
   0xf   : > { %s153_s4 = scalar_lea.vmem [#allocation4], %s829_s27  ;;  %p1155_p9 = pnand %p889_p8, %p1131_p3 }
  0x10   : > { %s162_s5 = sshll.u32 %s153_s4, 4  ;;  %p831_p10 = scmp.ge.s32.totalorder %s1061_s17, 1  ;;  %s163_s5 = int_to_ptr.vmem [resolvable:$true] %s162_s5 }
  0x11   : > { %s150_s7 = scalar_lea.sflag [#allocation5], %s149_s25  ;;  %p957_p11 = pneg %p1155_p9 }
  0x12   : > { %s968_s8 = scalar_lea.vmem %s163_s5, 2048  ;;  %s1063_s9 = smov [#allocation4]  }
  0x13   : > { %p969_p12 = scmp.ne.s32.totalorder %s163_s5, %s968_s8  ;;  %s973_s10 = sshll.u32 %s1063_s9, 4  ;;  %s974_s10 = int_to_ptr.vmem [resolvable:$false] %s973_s10 }
  0x14   : > { %s975_s11 = scalar_lea.vmem %s974_s10, 4096  ;;  %p976_p1 = scmp.lt.s32.totalorder %s163_s5, %s974_s10 }
  0x15   : > { %p971_p13 = pnand %p969_p12, %p957_p11  ;;  %p977_p2 = scmp.lt.s32.totalorder %s975_s11, %s968_s8 }
  0x17   : > { %p972_p0 = pneg %p971_p13  ;;  %p978_p3 = por %p977_p2, %p976_p1 }
  0x19   : > { %p979_p4 = pnand %p978_p3, %p972_p0 }
  0x1b   : > { %982 = shalt.err (!%p979_p4)
}
  0x1c   : > { %s1064_s12 = smov 384   ;;  %s1065_s20 = smov 128  }
  0x1d   : > { %s1066_s21 = smov 8   ;;  %p170_p5 = scmp.lt.s32.totalorder %s1061_s17, 4 }
  0x1e   : > { %888 = dma.hbm_to_vmem [thread:$0]  (!%p1155_p9), %s161_s30, 2048, %s163_s5, %s150_s7, %s1064_s12, %s1065_s20, %s1066_s21  }
  0x1f   : > { %p171_p6 = pnand %p831_p10, %p170_p5 }
  0x20   : > { %s176_s22 = sand.u32 (!%p171_p6), 1, %s1045_s13  }
  0x21   : > { %174 = sbr.rel (%p171_p6) target bundleno = 725 (0x2d5), region = 32  ;;  %s832_s25 = sshll.u32 (!%p171_p6), %s176_s22, 7 }
  0x22   : > { %s177_s26 = scalar_lea.sflag (!%p171_p6), [#allocation5], %s176_s22  ;;  %s1168_s27 = scalar_lea.vmem (!%p171_p6), [#allocation4], %s832_s25 }
  0x26   : > { %1032 = dma.done.wait (%p1140_p7), %s177_s26, 2048  }
  0x27   : > { %1034 = vsyncadd (%p1140_p7), %s177_s26, 4294965248  ;;  %p833_p8 = scmp.ne.s32.totalorder %s1053_s15, 0 }
  0x29   : > { %203 = sbr.rel (%p833_p8) target bundleno = 48 (0x30), region = 40 }
  0x2e   : > { %vm204_vm0 = vcmask 517120   ;;  %v1067_v0 = vmov 0.0   ;;  %v1068_v1 = vmov -inf  }
  0x2f   : > { %205 = vst.msk [vmem:[#allocation2] sm:$0x3] %vm204_vm0, %v1067_v0  ;;  %206 = vst.msk [vmem:[#allocation3] sm:$0x3] %vm204_vm0, %v1068_v1 }
  0x30 PF: > { %v223_v2 = vlaneseq  ;;  %s834_s28 = sshll.u32 %s1053_s15, 7  ;;  %v215_v5 = vld [vmem:[%s1168_s27 + $0x40] sm:$0xff]  ;;  %v216_v8 = vld [vmem:[%s1168_s27 + $0x48] sm:$0xff]  ;;  %v217_v18 = vld [vmem:[%s1168_s27 + $0x50] sm:$0xff]  ;;  %vm319_vm2 = vcmask 130112   ;;  %vm326_vm3 = vcmask 195712  }
  0x31   : > { %v226_v3 = vstv %s834_s28  ;;  %v207_v7 = vld [vmem:[%s1168_s27] sm:$0xff]  ;;  %v208_v9 = vld [vmem:[%s1168_s27 + $0x8] sm:$0xff]  ;;  %v209_v19 = vld [vmem:[%s1168_s27 + $0x10] sm:$0xff]  ;;  %vm333_vm4 = vcmask 261312   ;;  %vm340_vm5 = vcmask 326912   ;;  %vm347_vm6 = vcmask 392512  }
  0x32   : > { %v1177_v4 = vand.u32 127, %v223_v2  ;;  %v218_v24 = vld [vmem:[%s1168_s27 + $0x58] sm:$0xff]  ;;  %v219_v30 = vld [vmem:[%s1168_s27 + $0x60] sm:$0xff]  ;;  %v220_v36 = vld [vmem:[%s1168_s27 + $0x68] sm:$0xff]  ;;  %vm354_vm7 = vcmask 458112   ;;  %vm361_vm8 = vcmask 523712  }
  0x33   : > { %v210_v25 = vld [vmem:[%s1168_s27 + $0x18] sm:$0xff]  ;;  %v211_v31 = vld [vmem:[%s1168_s27 + $0x20] sm:$0xff]  ;;  %v212_v37 = vld [vmem:[%s1168_s27 + $0x28] sm:$0xff]  ;;  %vm402_vm9 = vcmask 1041409   ;;  %vm406_vm10 = vcmask 517120   ;;  %p835_p7 = scmp.ne.s32.totalorder %s1053_s15, 2 }
  0x34   : > { %v1181_v6 = vadd.s32 %v226_v3, %v1177_v4  ;;  %v221_v42 = vld [vmem:[%s1168_s27 + $0x70] sm:$0xff]  ;;  %v222_v48 = vld [vmem:[%s1168_s27 + $0x78] sm:$0xff] }
  0x35   : > { %v213_v43 = vld [vmem:[%s1168_s27 + $0x30] sm:$0xff]  ;;  %v214_v49 = vld [vmem:[%s1168_s27 + $0x38] sm:$0xff] }
  0x36   : > { %vm228_vm1 = vcmp.lt.s32.totalorder %v1181_v6, 320 }
  0x37   : > { %v237_v10 = vsel %vm228_vm1, %v215_v5, 0.0  ;;  %v229_v11 = vsel %vm228_vm1, %v207_v7, 0.0  ;;  %v238_v12 = vsel %vm228_vm1, %v216_v8, 0.0  ;;  %v230_v13 = vsel %vm228_vm1, %v208_v9, 0.0 }
  0x38   : > { %278 = vadd.xlane.f32.xlu1 %v237_v10  ;;  %262 = vadd.xlane.f32.xlu0 %v229_v11  ;;  %v246_v14 = vsel %vm228_vm1, %v208_v9, -inf  ;;  %v245_v15 = vsel %vm228_vm1, %v207_v7, -inf  ;;  %v254_v16 = vsel %vm228_vm1, %v216_v8, -inf  ;;  %v253_v17 = vsel %vm228_vm1, %v215_v5, -inf }
  0x39   : > { %v239_v20 = vsel %vm228_vm1, %v217_v18, 0.0  ;;  %v231_v21 = vsel %vm228_vm1, %v209_v19, 0.0  ;;  %v255_v22 = vsel %vm228_vm1, %v217_v18, -inf  ;;  %v247_v23 = vsel %vm228_vm1, %v209_v19, -inf }
  0x3a   : > { %v240_v26 = vsel %vm228_vm1, %v218_v24, 0.0  ;;  %v232_v27 = vsel %vm228_vm1, %v210_v25, 0.0  ;;  %v256_v28 = vsel %vm228_vm1, %v218_v24, -inf  ;;  %v248_v29 = vsel %vm228_vm1, %v210_v25, -inf }
  0x3b   : > { %v241_v32 = vsel %vm228_vm1, %v219_v30, 0.0  ;;  %v233_v33 = vsel %vm228_vm1, %v211_v31, 0.0  ;;  %v257_v34 = vsel %vm228_vm1, %v219_v30, -inf  ;;  %v249_v35 = vsel %vm228_vm1, %v211_v31, -inf }
  0x3c   : > { %280 = vadd.xlane.f32.xlu1 %v238_v12  ;;  %264 = vadd.xlane.f32.xlu0 %v230_v13  ;;  %v242_v38 = vsel %vm228_vm1, %v220_v36, 0.0  ;;  %v234_v39 = vsel %vm228_vm1, %v212_v37, 0.0  ;;  %v258_v40 = vsel %vm228_vm1, %v220_v36, -inf  ;;  %v250_v41 = vsel %vm228_vm1, %v212_v37, -inf }
  0x3d   : > { %v243_v44 = vsel %vm228_vm1, %v221_v42, 0.0  ;;  %v235_v45 = vsel %vm228_vm1, %v213_v43, 0.0  ;;  %v259_v46 = vsel %vm228_vm1, %v221_v42, -inf  ;;  %v251_v47 = vsel %vm228_vm1, %v213_v43, -inf }
  0x3e   : > { %v244_v50 = vsel %vm228_vm1, %v222_v48, 0.0  ;;  %v236_v51 = vsel %vm228_vm1, %v214_v49, 0.0  ;;  %v260_v52 = vsel %vm228_vm1, %v222_v48, -inf  ;;  %v252_v53 = vsel %vm228_vm1, %v214_v49, -inf }
  0x3f   : > { %v314_v12 = vadd.s32 4294967288, %v1177_v4  ;;  %v1303_v13 = vshrl.u32 %v223_v2, 7  ;;  %v335_v18 = vadd.s32 4294967264, %v1177_v4 }
  0x40   : > { %411 = vmax.xlane.f32.xlu1 %v246_v14  ;;  %409 = vmax.xlane.f32.xlu0 %v245_v15  ;;  %v321_v14 = vadd.s32 4294967280, %v1177_v4 }
  0x41   : > { %v317_v19 = vsub.s32 %v314_v12, %v1303_v13  ;;  %v312_v2 = vsub.s32 %v1177_v4, %v1303_v13 }
  0x44   : > { %427 = vmax.xlane.f32.xlu1 %v254_v16  ;;  %425 = vmax.xlane.f32.xlu0 %v253_v17  ;;  %v328_v17 = vadd.s32 4294967272, %v1177_v4 }
  0x48   : > { %282 = vadd.xlane.f32.xlu1 %v239_v20  ;;  %266 = vadd.xlane.f32.xlu0 %v231_v21  ;;  %v342_v20 = vadd.s32 4294967256, %v1177_v4  ;;  %v349_v21 = vadd.s32 4294967248, %v1177_v4 }
  0x4c   : > { %429 = vmax.xlane.f32.xlu1 %v255_v22  ;;  %413 = vmax.xlane.f32.xlu0 %v247_v23  ;;  %v356_v22 = vadd.s32 4294967240, %v1177_v4  ;;  %v324_v23 = vsub.s32 %v321_v14, %v1303_v13  ;;  %v1333_v4 = vsub.s32 %v349_v21, %v1303_v13 }
  0x50   : > { %284 = vadd.xlane.f32.xlu1 %v240_v26  ;;  %268 = vadd.xlane.f32.xlu0 %v232_v27  ;;  %v1324_v26 = vsub.s32 %v328_v17, %v1303_v13  ;;  %v1327_v27 = vsub.s32 %v335_v18, %v1303_v13 }
  0x54   : > { %431 = vmax.xlane.f32.xlu1 %v256_v28  ;;  %415 = vmax.xlane.f32.xlu0 %v248_v29  ;;  %v1330_v29 = vsub.s32 %v342_v20, %v1303_v13 }
  0x58   : > { %286 = vadd.xlane.f32.xlu1 %v241_v32  ;;  %270 = vadd.xlane.f32.xlu0 %v233_v33  ;;  %v1339_v33 = vsub.s32 %v356_v22, %v1303_v13  ;;  %v261_v22 = vld [vmem:[#allocation2] sm:$0x3] }
  0x5c   : > { %433 = vmax.xlane.f32.xlu1 %v257_v34  ;;  %417 = vmax.xlane.f32.xlu0 %v249_v35 }
  0x60   : > { %288 = vadd.xlane.f32.xlu1 %v242_v38  ;;  %272 = vadd.xlane.f32.xlu0 %v234_v39 }
  0x64   : > { %435 = vmax.xlane.f32.xlu1 %v258_v40  ;;  %419 = vmax.xlane.f32.xlu0 %v250_v41 }
  0x68   : > { %290 = vadd.xlane.f32.xlu1 %v243_v44  ;;  %274 = vadd.xlane.f32.xlu0 %v235_v45 }
  0x6c   : > { %437 = vmax.xlane.f32.xlu1 %v259_v46  ;;  %421 = vmax.xlane.f32.xlu0 %v251_v47 }
  0x70   : > { %292 = vadd.xlane.f32.xlu1 %v244_v50  ;;  %276 = vadd.xlane.f32.xlu0 %v236_v51 }
  0x74   : > { %439 = vmax.xlane.f32.xlu1 %v260_v52  ;;  %423 = vmax.xlane.f32.xlu0 %v252_v53 }
  0xc1   : > { %v1263_v54 = vpop.xlane.xlu1 %278  ;;  %v1265_v55 = vpop.xlane.xlu0 %262 }
  0xc2   : > { %v366_v34 = vrot.slane %v1263_v54, %v312_v2  ;;  %v313_v40 = vrot.slane %v1265_v55, %v312_v2 }
  0xc5   : > { %v281_v56 = vpop.xlane.xlu1 %280  ;;  %v1267_v57 = vpop.xlane.xlu0 %264 }
  0xc6   : > { %v370_v28 = vrot.slane %v281_v56, %v317_v19  ;;  %v318_v30 = vrot.slane %v1267_v57, %v317_v19 }
  0xc8   : > { %v371_v44 = vsel %vm319_vm2, %v370_v28, %v366_v34  ;;  %v320_v47 = vsel %vm319_vm2, %v318_v30, %v313_v40 }
  0xc9   : > { %v1269_v58 = vpop.xlane.xlu1 %411  ;;  %v1271_v59 = vpop.xlane.xlu0 %409 }
  0xca   : > { %v464_v31 = vrot.slane %v1269_v58, %v317_v19  ;;  %v460_v32 = vrot.slane %v1271_v59, %v312_v2 }
  0xcc   : > { %v465_v48 = vsel %vm319_vm2, %v464_v31, %v460_v32 }
  0xcd   : > { %v1273_v60 = vpop.xlane.xlu1 %427  ;;  %v1275_v61 = vpop.xlane.xlu0 %425 }
  0xce   : > { %v503_v35 = vrot.slane %v1273_v60, %v317_v19  ;;  %v499_v36 = vrot.slane %v1275_v61, %v312_v2 }
  0xd0   : > { %v504_v51 = vsel %vm319_vm2, %v503_v35, %v499_v36 }
  0xd1   : > { %v1277_v62 = vpop.xlane.xlu1 %282  ;;  %v1279_v63 = vpop.xlane.xlu0 %266 }
  0xd2   : > { %v375_v37 = vrot.slane %v1277_v62, %v324_v23  ;;  %v325_v41 = vrot.slane %v1279_v63, %v324_v23 }
  0xd4   : > { %v376_v52 = vsel %vm326_vm3, %v375_v37, %v371_v44  ;;  %v327_v57 = vsel %vm326_vm3, %v325_v41, %v320_v47  ;;  %v408_v37 = vld [vmem:[#allocation3] sm:$0x3] }
  0xd5   : > { %v1281_v0 = vpop.xlane.xlu1 %429  ;;  %v1283_v1 = vpop.xlane.xlu0 %413 }
  0xd6   : > { %v508_v42 = vrot.slane %v1281_v0, %v324_v23  ;;  %v469_v43 = vrot.slane %v1283_v1, %v324_v23 }
  0xd8   : > { %v509_v58 = vsel %vm326_vm3, %v508_v42, %v504_v51  ;;  %v470_v59 = vsel %vm326_vm3, %v469_v43, %v465_v48 }
  0xd9   : > { %v1285_v3 = vpop.xlane.xlu1 %284  ;;  %v1287_v5 = vpop.xlane.xlu0 %268 }
  0xda   : > { %v380_v45 = vrot.slane %v1285_v3, %v1324_v26  ;;  %v332_v46 = vrot.slane %v1287_v5, %v1324_v26 }
  0xdc   : > { %v381_v61 = vsel %vm333_vm4, %v380_v45, %v376_v52  ;;  %v334_v62 = vsel %vm333_vm4, %v332_v46, %v327_v57 }
  0xdd   : > { %v1289_v6 = vpop.xlane.xlu1 %431  ;;  %v1291_v7 = vpop.xlane.xlu0 %415 }
  0xde   : > { %v513_v49 = vrot.slane %v1289_v6, %v1324_v26  ;;  %v474_v3 = vrot.slane %v1291_v7, %v1324_v26 }
  0xe0   : > { %v514_v1 = vsel %vm333_vm4, %v513_v49, %v509_v58  ;;  %v475_v2 = vsel %vm333_vm4, %v474_v3, %v470_v59 }
  0xe1   : > { %v1293_v8 = vpop.xlane.xlu1 %286  ;;  %v1295_v9 = vpop.xlane.xlu0 %270 }
  0xe2   : > { %v385_v50 = vrot.slane %v1293_v8, %v1327_v27  ;;  %v339_v53 = vrot.slane %v1295_v9, %v1327_v27 }
  0xe4   : > { %v386_v5 = vsel %vm340_vm5, %v385_v50, %v381_v61  ;;  %v341_v8 = vsel %vm340_vm5, %v339_v53, %v334_v62 }
  0xe5   : > { %v1297_v10 = vpop.xlane.xlu1 %433  ;;  %v1299_v11 = vpop.xlane.xlu0 %417 }
  0xe6   : > { %v518_v6 = vrot.slane %v1297_v10, %v1327_v27  ;;  %v479_v9 = vrot.slane %v1299_v11, %v1327_v27 }
  0xe8   : > { %v519_v23 = vsel %vm340_vm5, %v518_v6, %v514_v1  ;;  %v480_v26 = vsel %vm340_vm5, %v479_v9, %v475_v2 }
  0xe9   : > { %v1306_v15 = vpop.xlane.xlu1 %288  ;;  %v1308_v16 = vpop.xlane.xlu0 %272 }
  0xea   : > { %v390_v54 = vrot.slane %v1306_v15, %v1330_v29  ;;  %v346_v60 = vrot.slane %v1308_v16, %v1330_v29 }
  0xec   : > { %v391_v12 = vsel %vm347_vm6, %v390_v54, %v386_v5  ;;  %v348_v17 = vsel %vm347_vm6, %v346_v60, %v341_v8 }
  0xed   : > { %v1319_v24 = vpop.xlane.xlu1 %435  ;;  %v1321_v25 = vpop.xlane.xlu0 %419 }
  0xee   : > { %v523_v14 = vrot.slane %v1319_v24, %v1330_v29  ;;  %v484_v7 = vrot.slane %v1321_v25, %v1330_v29 }
  0xf0   : > { %v524_v27 = vsel %vm347_vm6, %v523_v14, %v519_v23 }
  0xf1   : > { %v291_v38 = vpop.xlane.xlu1 %290  ;;  %v275_v39 = vpop.xlane.xlu0 %274 }
  0xf2   : > { %v395_v63 = vrot.slane %v291_v38, %v1333_v4  ;;  %v353_v0 = vrot.slane %v275_v39, %v1333_v4 }
  0xf4   : > { %v396_v19 = vsel %vm354_vm7, %v395_v63, %v391_v12  ;;  %v355_v11 = vsel %vm354_vm7, %v353_v0, %v348_v17 }
  0xf5   : > { %v438_v55 = vpop.xlane.xlu1 %437  ;;  %v422_v56 = vpop.xlane.xlu0 %421 }
  0xf6   : > { %v528_v20 = vrot.slane %v438_v55, %v1333_v4  ;;  %v489_v21 = vrot.slane %v422_v56, %v1333_v4  ;;  %v485_v4 = vsel %vm347_vm6, %v484_v7, %v480_v26 }
  0xf8   : > { %v529_v35 = vsel %vm354_vm7, %v528_v20, %v524_v27  ;;  %v490_v36 = vsel %vm354_vm7, %v489_v21, %v485_v4 }
  0xf9   : > { %v293_v15 = vpop.xlane.xlu1 %292  ;;  %v277_v16 = vpop.xlane.xlu0 %276 }
  0xfa   : > { %v400_v18 = vrot.slane %v293_v15, %v1339_v33  ;;  %v360_v10 = vrot.slane %v277_v16, %v1339_v33 }
  0xfc   : > { %v401_v24 = vsel %vm361_vm8, %v400_v18, %v396_v19  ;;  %v362_v25 = vsel %vm361_vm8, %v360_v10, %v355_v11 }
  0xfd   : > { %v403_v28 = vsel %vm402_vm9, %v401_v24, %v362_v25  ;;  %v440_v29 = vpop.xlane.xlu1 %439  ;;  %v424_v30 = vpop.xlane.xlu0 %423 }
  0xfe   : > { %v405_v31 = vadd.f32 %v403_v28, %v261_v22  ;;  %v533_v32 = vrot.slane %v440_v29, %v1339_v33  ;;  %v494_v34 = vrot.slane %v424_v30, %v1339_v33 }
 0x100   : > { %407 = vst.msk [vmem:[#allocation2] sm:$0x3] %vm406_vm10, %v405_v31  ;;  %v534_v38 = vsel %vm361_vm8, %v533_v32, %v529_v35  ;;  %v495_v39 = vsel %vm361_vm8, %v494_v34, %v490_v36  ;;  %542 = sbr.rel (%p835_p7) target bundleno = 709 (0x2c5), region = 44 }
 0x101   : > { %v535_v40 = vsel %vm402_vm9, %v534_v38, %v495_v39 }
 0x102   : > { %v537_v41 = vmax.f32 %v408_v37, %v535_v40 }
 0x104   : > { %538 = vst.msk [vmem:[#allocation3] sm:$0x3] %vm406_vm10, %v537_v41 }
 0x105   : > { %v558_v33 = vld [vmem:[%s1478_s1 + $0x38] sm:$0xff]  ;;  %v1069_v42 = vmov 0.0   ;;  %v557_v43 = vld [vmem:[%s1478_s1 + $0x30] sm:$0xff]  ;;  %vm1070_vm11 = vmmov 0   ;;  %v556_v44 = vld [vmem:[%s1478_s1 + $0x28] sm:$0xff]  ;;  %vm549_vm12 = vcmask 1041408  }
 0x106   : > { %855 = vmatprep.subr.mxu0 %v1069_v42  ;;  %871 = vmatprep.mubr.msk.f32.mxu0 %vm1070_vm11, %v1069_v42  ;;  %v555_v45 = vld [vmem:[%s1478_s1 + $0x20] sm:$0xff]  ;;  %v554_v46 = vld [vmem:[%s1478_s1 + $0x18] sm:$0xff]  ;;  %v553_v49 = vld [vmem:[%s1478_s1 + $0x10] sm:$0xff]  ;;  %vm560_vm13 = vcmask 523264   ;;  %vm639_vm14 = vcmask 1043456   ;;  %vm635_vm15 = vcmask 31744  }
 0x107   : > { %856 = vmatpush3.msra.mxu0 %v558_v33  ;;  %874 = vmatprep.subr.mxu1 %v1069_v42  ;;  %v543_v47 = vld [vmem:[#allocation2] sm:$0x3]  ;;  %v552_v52 = vld [vmem:[%s1478_s1 + $0x8] sm:$0xff]  ;;  %v1071_v3 = vmov 1966171168   ;;  %vm748_vm0 = vcmask 516096  }
 0x108   : > { %857 = vmatprep.subr.mxu0 %v1069_v42  ;;  %876 = vmatprep.mubr.msk.f32.mxu1 %vm1070_vm11, %v1069_v42  ;;  %v544_v50 = vmul.f32 0.003125, %v543_v47  ;;  %v551_v53 = vld [vmem:[%s1478_s1] sm:$0xff]  ;;  %v725_v5 = vunpack.c.l.s4 %v1071_v3 }
 0x109   : > { %858 = vmatpush3.msra.mxu0 %v557_v43  ;;  %v559_v55 = vld [vmem:[%s1479_s2] sm:$0xf] }
 0x10a   : > { %859 = vmatprep.subr.mxu0 %v1069_v42  ;;  %875 = vmatpush3.msk.msra.mxu1 %vm639_vm14, %v559_v55  ;;  %v726_v6 = vunpack.c.0.s8 %v725_v5 }
 0x10b   : > { %860 = vmatpush3.msra.mxu0 %v556_v44  ;;  %v545_v48 = vld [vmem:[#allocation3] sm:$0x3] }
 0x10c   : > { %861 = vmatprep.subr.mxu0 %v1069_v42  ;;  %v547_v51 = vrot.slane %v545_v48, 6  ;;  %v729_v8 = vsub.s32 %v726_v6, %v1303_v13 }
 0x10d   : > { %862 = vmatpush3.msra.mxu0 %v555_v45 }
 0x10e   : > { %863 = vmatprep.subr.mxu0 %v1069_v42  ;;  %v550_v54 = vsel %vm549_vm12, %v544_v50, %v547_v51 }
 0x10f   : > { %864 = vmatpush3.msra.mxu0 %v554_v46 }
 0x110   : > { %865 = vmatprep.subr.mxu0 %v1069_v42 }
 0x111   : > { %866 = vmatpush3.msra.mxu0 %v553_v49 }
 0x112   : > { %867 = vmatprep.subr.mxu0 %v1069_v42 }
 0x113   : > { %868 = vmatpush3.msra.mxu0 %v552_v52 }
 0x114   : > { %869 = vmatprep.subr.mxu0 %v1069_v42 }
 0x115   : > { %870 = vmatpush3.msra.mxu0 %v551_v53 }
 0x116   : > { %872 = vmatmul.mubr.msk.f32.vlgmr.msra.gmra.mxu0 %vm560_vm13, %v550_v54 }
 0x1d6   : > { %v630_v56 = vpop.f32.mrf.mxu0 }
 0x1d7   : > { %v634_v57 = vmax.f32 %v630_v56, 0.0 }
 0x1d8   : > { %v873_v58 = vpop.f32.mrf.mxu0 }
 0x1d9   : > { %877 = vmatmul.mubr.msk.f32.vlgmr.msra.gmra.mxu1 %vm635_vm15, %v634_v57 }
 0x299   : > { %v709_v59 = vpop.f32.mrf.mxu1 }
 0x29a   : > { %v714_v60 = vrot.slane %v709_v59, 2 }
 0x29b   : > { %v878_v61 = vpop.f32.mrf.mxu1 }
 0x29c   : > { %v716_v62 = vadd.f32 %v714_v60, %v709_v59 }
 0x29e   : > { %v839_v63 = vmul.f32 -1.442695, %v716_v62 }
 0x2a0   : > { %951 = vpow2.f32 %v839_v63 }
 0x2ad   : > { %v952_v0 = vpop.eup %951 }
 0x2ae   : > { %v720_v1 = vadd.f32 1.0, %v952_v0 }
 0x2b0   : > { %953 = vrcp.f32 %v720_v1 }
 0x2bd   : > { %v954_v9 = vpop.eup %953 }
 0x2be   : > { %v730_v12 = vrot.slane %v954_v9, %v729_v8 }
 0x2c0   : > { %v731_v14 = vcombine.high %v730_v12, %v730_v12  ;;  %v738_v15 = vrot.slane %v730_v12, %v729_v8 }
 0x2c2   : > { %v745_v16 = vrot.slane %v731_v14, %v729_v8  ;;  %749 = vst.msk [vmem:[#allocation7] sm:$0x1] %vm748_vm0, %v738_v15 }
 0x2c4   : > { %750 = vst.msk [vmem:[#allocation7 + $0x1] sm:$0x1] %vm748_vm0, %v745_v16 }
 0x2c5 PF: > { %p1444_p9 = scmp.eq.s32.totalorder %s826_s18, 2  ;;  %s1072_s28 = smov [#allocation7]  }
 0x2c6   : > { %s760_s23 = sshll.u32 %s1072_s28, 4  ;;  %s761_s23 = int_to_ptr.vmem [resolvable:$true] %s760_s23 }
 0x2c7   : > { %s983_s29 = scalar_lea.vmem %s761_s23, 32  ;;  %p990_p13 = scmp.lt.s32.totalorder %s761_s23, %s761_s23 }
 0x2c8   : > { %p984_p10 = scmp.ne.s32.totalorder %s761_s23, %s983_s29  ;;  %p991_p0 = scmp.lt.s32.totalorder %s983_s29, %s983_s29 }
 0x2ca   : > { %p985_p11 = pnand %p984_p10, %p1444_p9  ;;  %p992_p1 = por %p991_p0, %p990_p13 }
 0x2cc   : > { %p986_p12 = pneg %p985_p11 }
 0x2ce   : > { %p993_p2 = pnand %p992_p1, %p986_p12 }
 0x2d0   : > { %996 = shalt.err (!%p993_p2)
}
 0x2d1   : > { %s1073_s30 = smov 16   ;;  %s1074_s18 = smov 1  }
 0x2d2   : > { %882 = dma.vmem_to_hbm [thread:$0]  (%p1444_p9), %s761_s23, 32, %s1480_s3, [#allocation6], %s1073_s30, %s1073_s30, %s1074_s18  }
 0x2d3   : > { %1036 = dma.done.wait (%p1444_p9), [#allocation6], 32  }
 0x2d4   : > { %1038 = vsyncadd (%p1444_p9), [#allocation6], 4294967264 }
 0x2d5 PF: > { %s17_s17 = sadd.s32 1, %s1061_s17   ;;  %s1485_s12 = smov %s1045_s13 }
 0x2d6   : > { %p14_p3 = scmp.ge.s32.totalorder %s17_s17, 5   ;;  %s1486_s13 = smov %s1049_s14 }
 0x2d7   : > { %s1487_s14 = smov %s1146_s24  ;;  %s1488_s15 = smov %s1057_s16 }
 0x2d8   : > { %s1489_s16 = smov %s1491_s19  ;;  %16 = sbr.rel (!%p14_p3) target bundleno = 5 (0x5), region = 78 }
 0x2dd   :  { %776 = vsyncpa [#allocation5], 1 }
 0x2de   :  { %778 = vsyncpa [#allocation5 + $0x1], 1 }
 0x2df   :  { %779 = vsyncpa [#allocation6], 1 }
 0x2e0   :  { %781 = vsyncpa [#allocation6 + $0x1], 1 }

</bundles_post_ra>
